<compile_context>
chip_gen: v7x
topology: tpu7x:2x2x1
jax: 0.10.0
libtpu: 0.0.40
codegen_flags: <defaults>
</compile_context>

<pallas_src>
import functools
import math

import jax
import jax.numpy as jnp
from jax import lax
from jax.experimental import pallas as pl
from jax.experimental.pallas import tpu as pltpu


def _tanh_newton_kernel(x_ref, w_ref, z_ref, *, tol, max_iter, inner_iters):
    x = x_ref[...].astype(jnp.float32)          # (B, F)
    W = w_ref[...].astype(jnp.float32)          # (F, F) == nn.Linear.weight
    W_bf16 = W.astype(jnp.bfloat16)             # MXU feed for the inexact inner solve
    tol_sq = jnp.float32(tol) * jnp.float32(tol)

    def linear_f32(v):
        # v @ W.T (nn.Linear, bias=False); f32 path used for the residual so the
        # convergence decision matches the reference semantics.
        return lax.dot_general(v, W, dimension_numbers=(((1,), (1,)), ((), ())),
                               preferred_element_type=jnp.float32)

    def linear_bf16(v):
        # Same contraction with bf16 operands (bf16-native MXU on v6e/v7x), f32 acc.
        # Only used inside the inexact inner solve, so reduced precision is safe.
        return lax.dot_general(v.astype(jnp.bfloat16), W_bf16,
                               dimension_numbers=(((1,), (1,)), ((), ())),
                               preferred_element_type=jnp.float32)

    def tanh_forward(z):
        return jnp.tanh(linear_f32(z) + x)                     # (B, F)

    def residual(z):
        # t = tanh(W z + x); keep_going == (torch.norm(g) >= tol), NaN-safe
        # (NaN compares False -> loop exits, final guard zeroes the row).
        t = tanh_forward(z)
        g = z - t
        err2 = jnp.sum(g * g, keepdims=True)                   # (1, 1)
        keep_going = (err2[0, 0] >= tol_sq).astype(jnp.int32)  # scalar 0/1
        return t, keep_going

    def newton_step(z, t):
        # Inexact Newton: solve (I - diag(sech^2) W) dz = g with `inner_iters`
        # Richardson sweeps (truncated Neumann series).  sech^2 = 1 - tanh^2
        # reuses t; no Jacobian materialization, no division.
        g = z - t                                              # (B, F)
        sech2 = 1.0 - t * t                                    # (B, F)
        dz = g
        for _ in range(inner_iters):                           # short, fully unrolled
            dz = g + sech2 * linear_bf16(dz)
        return z - dz

    # ---- Newton iteration with early exit; convergence checked every 2 steps.
    z0 = jnp.tanh(x)
    t0, kg0 = residual(z0)

    def cond_fn(carry):
        it, keep_going, _, _ = carry
        return jnp.logical_and(it < max_iter, keep_going > 0)

    def body_fn(carry):
        it, _, z, t = carry
        z1 = newton_step(z, t)
        t1 = tanh_forward(z1)
        z2 = newton_step(z1, t1)
        t2, kg2 = residual(z2)          # one cross-lane reduce + scalar sync / 2 steps
        return it + 2, kg2, z2, t2

    _, _, z, t = lax.while_loop(cond_fn, body_fn, (jnp.int32(0), kg0, z0, t0))

    # Final per-row residual check (t already equals tanh(W z + x) for the final z).
    # Inverted predicate: keep only provably-converged rows, so NaN/Inf rows -> 0.
    g = z - t
    row_err2 = jnp.sum(g * g, axis=1, keepdims=True)           # (B, 1)
    z_ref[...] = jnp.where(row_err2 <= tol_sq, z, 0.0).astype(z_ref.dtype)


def tanh_newton_layer(x, W, tol=1e-4, max_iter=50, inner_iters=8):
    B, F = x.shape
    kernel = functools.partial(_tanh_newton_kernel, tol=float(tol),
                               max_iter=int(max_iter), inner_iters=int(inner_iters))
    # TODO(synk): for large B/F, tile B over a grid axis marked "parallel" (~2x on
    # v7x's 2 TCs, neutral on v5e/v6e), keep W resident via an index_map returning
    # (0, 0), present a lane-dense (>=128) stored last dim (pack batch on lanes when
    # F < 128), and set vmem_limit_bytes for the per-tile working set (~24-32 MiB on
    # v7x vs ~2x that on v5e/v6e).  At (B, F) = (2, 32) the kernel is latency-bound
    # and a single program processing the whole batch is the right shape.
    return pl.pallas_call(
        kernel,
        out_shape=jax.ShapeDtypeStruct((B, F), jnp.float32),
        grid=(1,),
        in_specs=[pl.BlockSpec((B, F), lambda i: (0, 0)),
                  pl.BlockSpec((F, F), lambda i: (0, 0))],
        out_specs=pl.BlockSpec((B, F), lambda i: (0, 0)),
        compiler_params=pltpu.CompilerParams(dimension_semantics=("arbitrary",)),
    )(x, W)


def _ref_forward(x, W, tol=1e-4, max_iter=50):
    # Pure-JAX reference mirroring the PyTorch forward (exact solve; sanity check).
    z = jnp.tanh(x)
    F = x.shape[1]
    for _ in range(max_iter):
        zl = z @ W.T + x
        g = z - jnp.tanh(zl)
        if float(jnp.linalg.norm(g)) < tol:
            break
        J = jnp.eye(F)[None] - (1.0 / jnp.cosh(zl) ** 2)[:, :, None] * W[None]
        dz = jnp.linalg.solve(J, g[:, :, None])[:, :, 0]
        z = z - dz
    g = z - jnp.tanh(z @ W.T + x)
    return jnp.where(jnp.linalg.norm(g, axis=1, keepdims=True) > tol, 0.0, z)


if __name__ == "__main__":
    B, F = 2, 32          # out_features = 32
    tol, max_iter = 1e-4, 50

    key = jax.random.PRNGKey(0)
    kx, kw = jax.random.split(key)
    x = jax.random.normal(kx, (B, F), dtype=jnp.float32) * 0.5
    bound = 1.0 / math.sqrt(F)   # nn.Linear default init scale
    W = jax.random.uniform(kw, (F, F), dtype=jnp.float32, minval=-bound, maxval=bound)

    z = tanh_newton_layer(x, W, tol=tol, max_iter=max_iter)
    jax.block_until_ready(z)

    z_ref = _ref_forward(x, W, tol=tol, max_iter=max_iter)
    assert z.shape == (B, F)
    assert bool(jnp.all(jnp.isfinite(z)))
    assert bool(jnp.allclose(z, z_ref, atol=5e-3)), "mismatch vs pure-JAX reference"

    print("KERNEL_OK")
</pallas_src>

<mosaic_0001>
module attributes {stable_mosaic.version = 11 : i64} {
  func.func @_tanh_newton_kernel(%arg0: i32, %arg1: memref<2x32xf32, #tpu.memory_space<vmem>>, %arg2: memref<32x32xf32, #tpu.memory_space<vmem>>, %arg3: memref<2x32xf32, #tpu.memory_space<vmem>>) attributes {dimension_semantics = [#tpu.dimension_semantics<arbitrary>], iteration_bounds = array<i64: 1>, scalar_prefetch = 0 : i64, scratch_operands = 0 : i64, tpu.core_type = #tpu.core_type<tc>, window_params = [{pipeline_mode = #tpu.pipeline_mode<synchronous>, transform_indices = @transform_0, window_bounds = array<i64: 2, 32>}, {pipeline_mode = #tpu.pipeline_mode<synchronous>, transform_indices = @transform_1, window_bounds = array<i64: 32, 32>}, {pipeline_mode = #tpu.pipeline_mode<synchronous>, transform_indices = @transform_2, window_bounds = array<i64: 2, 32>}]} {
    %c0 = arith.constant 0 : index
    %c0_0 = arith.constant 0 : index
    %0 = vector.load %arg1[%c0, %c0_0] : memref<2x32xf32, #tpu.memory_space<vmem>>, vector<2x32xf32>
    %c0_1 = arith.constant 0 : index
    %c0_2 = arith.constant 0 : index
    %1 = vector.load %arg2[%c0_1, %c0_2] : memref<32x32xf32, #tpu.memory_space<vmem>>, vector<32x32xf32>
    %2 = arith.truncf %1 : vector<32x32xf32> to vector<32x32xbf16>
    %cst = arith.constant 9.99999974E-5 : f32
    %cst_3 = arith.constant 9.99999974E-5 : f32
    %3 = arith.mulf %cst, %cst_3 : f32
    %4 = math.tanh %0 : vector<2x32xf32>
    %cst_4 = arith.constant dense<0.000000e+00> : vector<2x32xf32>
    %5 = tpu.matmul %4, %1, %cst_4 {dimension_numbers = #tpu.dot_dimension_numbers<[1], [1], [0], [0], [0, 0, 1, 0], [], []>} : vector<2x32xf32>, vector<32x32xf32>, vector<2x32xf32> -> vector<2x32xf32>
    %6 = arith.addf %5, %0 : vector<2x32xf32>
    %7 = math.tanh %6 : vector<2x32xf32>
    %8 = arith.subf %4, %7 : vector<2x32xf32>
    %9 = arith.mulf %8, %8 : vector<2x32xf32>
    %10 = vector.shape_cast %9 : vector<2x32xf32> to vector<1x2x32xf32>
    %cst_5 = arith.constant dense<0.000000e+00> : vector<1xf32>
    %11 = vector.multi_reduction <add>, %10, %cst_5 [1, 2] : vector<1x2x32xf32> to vector<1xf32>
    %12 = vector.shape_cast %11 : vector<1xf32> to vector<1x1x1xf32>
    %13 = vector.extract %12[0, 0, 0] : f32 from vector<1x1x1xf32>
    %14 = vector.broadcast %13 : f32 to vector<1x1xf32>
    %15 = vector.extract %14[0, 0] : f32 from vector<1x1xf32>
    %16 = arith.cmpf oge, %15, %3 : f32
    %17 = arith.extui %16 : i1 to i32
    %c0_i32 = arith.constant 0 : i32
    %18:4 = scf.while (%arg4 = %c0_i32, %arg5 = %17, %arg6 = %4, %arg7 = %7) : (i32, i32, vector<2x32xf32>, vector<2x32xf32>) -> (i32, i32, vector<2x32xf32>, vector<2x32xf32>) {
      %c50_i32 = arith.constant 50 : i32
      %30 = arith.cmpi slt, %arg4, %c50_i32 : i32
      %c0_i32_10 = arith.constant 0 : i32
      %31 = arith.cmpi sgt, %arg5, %c0_i32_10 : i32
      %32 = arith.andi %30, %31 : i1
      scf.condition(%32) %arg4, %arg5, %arg6, %arg7 : i32, i32, vector<2x32xf32>, vector<2x32xf32>
    } do {
    ^bb0(%arg4: i32, %arg5: i32, %arg6: vector<2x32xf32>, %arg7: vector<2x32xf32>):
      %30 = arith.subf %arg6, %arg7 : vector<2x32xf32>
      %31 = arith.mulf %arg7, %arg7 : vector<2x32xf32>
      %cst_10 = arith.constant 1.000000e+00 : f32
      %32 = vector.broadcast %cst_10 : f32 to vector<2x32xf32>
      %33 = arith.subf %32, %31 : vector<2x32xf32>
      %34 = arith.truncf %30 : vector<2x32xf32> to vector<2x32xbf16>
      %cst_11 = arith.constant dense<0.000000e+00> : vector<2x32xf32>
      %35 = tpu.matmul %34, %2, %cst_11 {dimension_numbers = #tpu.dot_dimension_numbers<[1], [1], [0], [0], [0, 0, 1, 0], [], []>} : vector<2x32xbf16>, vector<32x32xbf16>, vector<2x32xf32> -> vector<2x32xf32>
      %36 = arith.mulf %33, %35 : vector<2x32xf32>
      %37 = arith.addf %30, %36 : vector<2x32xf32>
      %38 = arith.truncf %37 : vector<2x32xf32> to vector<2x32xbf16>
      %cst_12 = arith.constant dense<0.000000e+00> : vector<2x32xf32>
      %39 = tpu.matmul %38, %2, %cst_12 {dimension_numbers = #tpu.dot_dimension_numbers<[1], [1], [0], [0], [0, 0, 1, 0], [], []>} : vector<2x32xbf16>, vector<32x32xbf16>, vector<2x32xf32> -> vector<2x32xf32>
      %40 = arith.mulf %33, %39 : vector<2x32xf32>
      %41 = arith.addf %30, %40 : vector<2x32xf32>
      %42 = arith.truncf %41 : vector<2x32xf32> to vector<2x32xbf16>
      %cst_13 = arith.constant dense<0.000000e+00> : vector<2x32xf32>
      %43 = tpu.matmul %42, %2, %cst_13 {dimension_numbers = #tpu.dot_dimension_numbers<[1], [1], [0], [0], [0, 0, 1, 0], [], []>} : vector<2x32xbf16>, vector<32x32xbf16>, vector<2x32xf32> -> vector<2x32xf32>
      %44 = arith.mulf %33, %43 : vector<2x32xf32>
      %45 = arith.addf %30, %44 : vector<2x32xf32>
      %46 = arith.truncf %45 : vector<2x32xf32> to vector<2x32xbf16>
      %cst_14 = arith.constant dense<0.000000e+00> : vector<2x32xf32>
      %47 = tpu.matmul %46, %2, %cst_14 {dimension_numbers = #tpu.dot_dimension_numbers<[1], [1], [0], [0], [0, 0, 1, 0], [], []>} : vector<2x32xbf16>, vector<32x32xbf16>, vector<2x32xf32> -> vector<2x32xf32>
      %48 = arith.mulf %33, %47 : vector<2x32xf32>
      %49 = arith.addf %30, %48 : vector<2x32xf32>
      %50 = arith.truncf %49 : vector<2x32xf32> to vector<2x32xbf16>
      %cst_15 = arith.constant dense<0.000000e+00> : vector<2x32xf32>
      %51 = tpu.matmul %50, %2, %cst_15 {dimension_numbers = #tpu.dot_dimension_numbers<[1], [1], [0], [0], [0, 0, 1, 0], [], []>} : vector<2x32xbf16>, vector<32x32xbf16>, vector<2x32xf32> -> vector<2x32xf32>
      %52 = arith.mulf %33, %51 : vector<2x32xf32>
      %53 = arith.addf %30, %52 : vector<2x32xf32>
      %54 = arith.truncf %53 : vector<2x32xf32> to vector<2x32xbf16>
      %cst_16 = arith.constant dense<0.000000e+00> : vector<2x32xf32>
      %55 = tpu.matmul %54, %2, %cst_16 {dimension_numbers = #tpu.dot_dimension_numbers<[1], [1], [0], [0], [0, 0, 1, 0], [], []>} : vector<2x32xbf16>, vector<32x32xbf16>, vector<2x32xf32> -> vector<2x32xf32>
      %56 = arith.mulf %33, %55 : vector<2x32xf32>
      %57 = arith.addf %30, %56 : vector<2x32xf32>
      %58 = arith.truncf %57 : vector<2x32xf32> to vector<2x32xbf16>
      %cst_17 = arith.constant dense<0.000000e+00> : vector<2x32xf32>
      %59 = tpu.matmul %58, %2, %cst_17 {dimension_numbers = #tpu.dot_dimension_numbers<[1], [1], [0], [0], [0, 0, 1, 0], [], []>} : vector<2x32xbf16>, vector<32x32xbf16>, vector<2x32xf32> -> vector<2x32xf32>
      %60 = arith.mulf %33, %59 : vector<2x32xf32>
      %61 = arith.addf %30, %60 : vector<2x32xf32>
      %62 = arith.truncf %61 : vector<2x32xf32> to vector<2x32xbf16>
      %cst_18 = arith.constant dense<0.000000e+00> : vector<2x32xf32>
      %63 = tpu.matmul %62, %2, %cst_18 {dimension_numbers = #tpu.dot_dimension_numbers<[1], [1], [0], [0], [0, 0, 1, 0], [], []>} : vector<2x32xbf16>, vector<32x32xbf16>, vector<2x32xf32> -> vector<2x32xf32>
      %64 = arith.mulf %33, %63 : vector<2x32xf32>
      %65 = arith.addf %30, %64 : vector<2x32xf32>
      %66 = arith.subf %arg6, %65 : vector<2x32xf32>
      %cst_19 = arith.constant dense<0.000000e+00> : vector<2x32xf32>
      %67 = tpu.matmul %66, %1, %cst_19 {dimension_numbers = #tpu.dot_dimension_numbers<[1], [1], [0], [0], [0, 0, 1, 0], [], []>} : vector<2x32xf32>, vector<32x32xf32>, vector<2x32xf32> -> vector<2x32xf32>
      %68 = arith.addf %67, %0 : vector<2x32xf32>
      %69 = math.tanh %68 : vector<2x32xf32>
      %70 = arith.subf %66, %69 : vector<2x32xf32>
      %71 = arith.mulf %69, %69 : vector<2x32xf32>
      %cst_20 = arith.constant 1.000000e+00 : f32
      %72 = vector.broadcast %cst_20 : f32 to vector<2x32xf32>
      %73 = arith.subf %72, %71 : vector<2x32xf32>
      %74 = arith.truncf %70 : vector<2x32xf32> to vector<2x32xbf16>
      %cst_21 = arith.constant dense<0.000000e+00> : vector<2x32xf32>
      %75 = tpu.matmul %74, %2, %cst_21 {dimension_numbers = #tpu.dot_dimension_numbers<[1], [1], [0], [0], [0, 0, 1, 0], [], []>} : vector<2x32xbf16>, vector<32x32xbf16>, vector<2x32xf32> -> vector<2x32xf32>
      %76 = arith.mulf %73, %75 : vector<2x32xf32>
      %77 = arith.addf %70, %76 : vector<2x32xf32>
      %78 = arith.truncf %77 : vector<2x32xf32> to vector<2x32xbf16>
      %cst_22 = arith.constant dense<0.000000e+00> : vector<2x32xf32>
      %79 = tpu.matmul %78, %2, %cst_22 {dimension_numbers = #tpu.dot_dimension_numbers<[1], [1], [0], [0], [0, 0, 1, 0], [], []>} : vector<2x32xbf16>, vector<32x32xbf16>, vector<2x32xf32> -> vector<2x32xf32>
      %80 = arith.mulf %73, %79 : vector<2x32xf32>
      %81 = arith.addf %70, %80 : vector<2x32xf32>
      %82 = arith.truncf %81 : vector<2x32xf32> to vector<2x32xbf16>
      %cst_23 = arith.constant dense<0.000000e+00> : vector<2x32xf32>
      %83 = tpu.matmul %82, %2, %cst_23 {dimension_numbers = #tpu.dot_dimension_numbers<[1], [1], [0], [0], [0, 0, 1, 0], [], []>} : vector<2x32xbf16>, vector<32x32xbf16>, vector<2x32xf32> -> vector<2x32xf32>
      %84 = arith.mulf %73, %83 : vector<2x32xf32>
      %85 = arith.addf %70, %84 : vector<2x32xf32>
      %86 = arith.truncf %85 : vector<2x32xf32> to vector<2x32xbf16>
      %cst_24 = arith.constant dense<0.000000e+00> : vector<2x32xf32>
      %87 = tpu.matmul %86, %2, %cst_24 {dimension_numbers = #tpu.dot_dimension_numbers<[1], [1], [0], [0], [0, 0, 1, 0], [], []>} : vector<2x32xbf16>, vector<32x32xbf16>, vector<2x32xf32> -> vector<2x32xf32>
      %88 = arith.mulf %73, %87 : vector<2x32xf32>
      %89 = arith.addf %70, %88 : vector<2x32xf32>
      %90 = arith.truncf %89 : vector<2x32xf32> to vector<2x32xbf16>
      %cst_25 = arith.constant dense<0.000000e+00> : vector<2x32xf32>
      %91 = tpu.matmul %90, %2, %cst_25 {dimension_numbers = #tpu.dot_dimension_numbers<[1], [1], [0], [0], [0, 0, 1, 0], [], []>} : vector<2x32xbf16>, vector<32x32xbf16>, vector<2x32xf32> -> vector<2x32xf32>
      %92 = arith.mulf %73, %91 : vector<2x32xf32>
      %93 = arith.addf %70, %92 : vector<2x32xf32>
      %94 = arith.truncf %93 : vector<2x32xf32> to vector<2x32xbf16>
      %cst_26 = arith.constant dense<0.000000e+00> : vector<2x32xf32>
      %95 = tpu.matmul %94, %2, %cst_26 {dimension_numbers = #tpu.dot_dimension_numbers<[1], [1], [0], [0], [0, 0, 1, 0], [], []>} : vector<2x32xbf16>, vector<32x32xbf16>, vector<2x32xf32> -> vector<2x32xf32>
      %96 = arith.mulf %73, %95 : vector<2x32xf32>
      %97 = arith.addf %70, %96 : vector<2x32xf32>
      %98 = arith.truncf %97 : vector<2x32xf32> to vector<2x32xbf16>
      %cst_27 = arith.constant dense<0.000000e+00> : vector<2x32xf32>
      %99 = tpu.matmul %98, %2, %cst_27 {dimension_numbers = #tpu.dot_dimension_numbers<[1], [1], [0], [0], [0, 0, 1, 0], [], []>} : vector<2x32xbf16>, vector<32x32xbf16>, vector<2x32xf32> -> vector<2x32xf32>
      %100 = arith.mulf %73, %99 : vector<2x32xf32>
      %101 = arith.addf %70, %100 : vector<2x32xf32>
      %102 = arith.truncf %101 : vector<2x32xf32> to vector<2x32xbf16>
      %cst_28 = arith.constant dense<0.000000e+00> : vector<2x32xf32>
      %103 = tpu.matmul %102, %2, %cst_28 {dimension_numbers = #tpu.dot_dimension_numbers<[1], [1], [0], [0], [0, 0, 1, 0], [], []>} : vector<2x32xbf16>, vector<32x32xbf16>, vector<2x32xf32> -> vector<2x32xf32>
      %104 = arith.mulf %73, %103 : vector<2x32xf32>
      %105 = arith.addf %70, %104 : vector<2x32xf32>
      %106 = arith.subf %66, %105 : vector<2x32xf32>
      %cst_29 = arith.constant dense<0.000000e+00> : vector<2x32xf32>
      %107 = tpu.matmul %106, %1, %cst_29 {dimension_numbers = #tpu.dot_dimension_numbers<[1], [1], [0], [0], [0, 0, 1, 0], [], []>} : vector<2x32xf32>, vector<32x32xf32>, vector<2x32xf32> -> vector<2x32xf32>
      %108 = arith.addf %107, %0 : vector<2x32xf32>
      %109 = math.tanh %108 : vector<2x32xf32>
      %110 = arith.subf %106, %109 : vector<2x32xf32>
      %111 = arith.mulf %110, %110 : vector<2x32xf32>
      %112 = vector.shape_cast %111 : vector<2x32xf32> to vector<1x2x32xf32>
      %cst_30 = arith.constant dense<0.000000e+00> : vector<1xf32>
      %113 = vector.multi_reduction <add>, %112, %cst_30 [1, 2] : vector<1x2x32xf32> to vector<1xf32>
      %114 = vector.shape_cast %113 : vector<1xf32> to vector<1x1x1xf32>
      %115 = vector.extract %114[0, 0, 0] : f32 from vector<1x1x1xf32>
      %116 = vector.broadcast %115 : f32 to vector<1x1xf32>
      %117 = vector.extract %116[0, 0] : f32 from vector<1x1xf32>
      %118 = arith.cmpf oge, %117, %3 : f32
      %119 = arith.extui %118 : i1 to i32
      %c2_i32 = arith.constant 2 : i32
      %120 = arith.addi %arg4, %c2_i32 : i32
      scf.yield %120, %119, %106, %109 : i32, i32, vector<2x32xf32>, vector<2x32xf32>
    }
    %19 = arith.subf %18#2, %18#3 : vector<2x32xf32>
    %20 = arith.mulf %19, %19 : vector<2x32xf32>
    %cst_6 = arith.constant dense<0.000000e+00> : vector<2xf32>
    %21 = vector.multi_reduction <add>, %20, %cst_6 [1] : vector<2x32xf32> to vector<2xf32>
    %22 = vector.shape_cast %21 : vector<2xf32> to vector<2x1xf32>
    %23 = vector.broadcast %3 : f32 to vector<2x1xf32>
    %24 = arith.cmpf ole, %22, %23 : vector<2x1xf32>
    %cst_7 = arith.constant 0.000000e+00 : f32
    %25 = vector.shape_cast %24 : vector<2x1xi1> to vector<2x1xi1>
    %26 = vector.broadcast %25 : vector<2x1xi1> to vector<2x32xi1>
    %27 = vector.broadcast %cst_7 : f32 to vector<2x32xf32>
    %28 = arith.select %26, %18#2, %27 : vector<2x32xi1>, vector<2x32xf32>
    %c0_8 = arith.constant 0 : index
    %c0_9 = arith.constant 0 : index
    %29 = vector.load %arg3[%c0_8, %c0_9] : memref<2x32xf32, #tpu.memory_space<vmem>>, vector<2x32xf32>
    tpu.vector_store %arg3[%c0_8, %c0_9], %28 {strides = array<i32>} : memref<2x32xf32, #tpu.memory_space<vmem>>, vector<2x32xf32>,
    return
  }
  func.func @transform_0(%arg0: i32) -> (i32, i32) {
    %c0_i32 = arith.constant 0 : i32
    %c0_i32_0 = arith.constant 0 : i32
    %c0_i32_1 = arith.constant 0 : i32
    return %c0_i32, %c0_i32_0 : i32, i32
  }
  func.func @transform_1(%arg0: i32) -> (i32, i32) {
    %c0_i32 = arith.constant 0 : i32
    %c0_i32_0 = arith.constant 0 : i32
    %c0_i32_1 = arith.constant 0 : i32
    return %c0_i32, %c0_i32_0 : i32, i32
  }
  func.func @transform_2(%arg0: i32) -> (i32, i32) {
    %c0_i32 = arith.constant 0 : i32
    %c0_i32_0 = arith.constant 0 : i32
    %c0_i32_1 = arith.constant 0 : i32
    return %c0_i32, %c0_i32_0 : i32, i32
  }
}

</mosaic_0001>

<bundles_post_ra>
// kernel: tpu_custom_call.1
= control target key start
LH: loop header
LB: loop body
LE: loop exit
PB: predicated region body
PF: predicated region fallthrough
CT: control target
= control target key end

     0   :  { %7 = vsyncpa [#allocation3], 0  ;;  %s1887_s0 = inlined_call_operand.hbm [shape: f32[2,32], index: 0, kind: input, shape index: {}]   ;;  %s1888_s1 = inlined_call_operand.hbm [shape: f32[32,32], index: 1, kind: input, shape index: {}]   ;;  %s1889_s2 = inlined_call_operand.hbm [shape: f32[2,32], index: 2, kind: output, shape index: {}]  }
   0x1   :  { %8 = vsyncpa [#allocation6], 0 }
   0x2   :  { %9 = vsyncpa [#allocation4], 0  ;;  %s1568_s9 = smov [#allocation2]   ;;  %s1569_s11 = smov [#allocation5]  }
   0x3   :  { %s16_s10 = sshll.u32 %s1568_s9, 4  ;;  %s25_s12 = sshll.u32 %s1569_s11, 4  ;;  %s17_s10 = int_to_ptr.vmem [resolvable:$true] %s16_s10  ;;  %s1594_s12 = int_to_ptr.vmem [resolvable:$true] %s25_s12 }
   0x4   :  { %s1456_s15 = scalar_lea.hbm %s1887_s0, 32 }
   0x5   :  { %p1457_p0 = scmp.ne.s32.totalorder %s1887_s0, %s1456_s15  ;;  %p1460_p1 = scmp.lt.u32.totalorder %s1456_s15, %s1887_s0 }
   0x7   :  { %p1462_p2 = pnand %p1460_p1, %p1457_p0 }
   0x9   :  { %1465 = shalt.err (!%p1462_p2)
}
   0xa   :  { %s1466_s20 = scalar_lea.vmem %s17_s10, 32  ;;  %p1471_p4 = scmp.lt.s32.totalorder %s17_s10, %s17_s10 }
   0xb   :  { %p1467_p3 = scmp.ne.s32.totalorder %s17_s10, %s1466_s20  ;;  %p1472_p5 = scmp.lt.s32.totalorder %s1466_s20, %s1466_s20 }
   0xd   :  { %p1473_p6 = por %p1472_p5, %p1471_p4 }
   0xf   :  { %p1474_p7 = pnand %p1473_p6, %p1467_p3 }
  0x11   :  { %1477 = shalt.err (!%p1474_p7)
}
  0x12   :  { %19 = dma.hbm_to_vmem [thread:$0]  %s1887_s0, 32, %s17_s10, [#allocation3]  }
  0x13   :  { %s1478_s25 = scalar_lea.hbm %s1888_s1, 512 }
  0x14   :  { %p1479_p8 = scmp.ne.s32.totalorder %s1888_s1, %s1478_s25  ;;  %p1482_p9 = scmp.lt.u32.totalorder %s1478_s25, %s1888_s1 }
  0x16   :  { %p1484_p10 = pnand %p1482_p9, %p1479_p8 }
  0x18   :  { %1487 = shalt.err (!%p1484_p10)
}
  0x19   :  { %s1488_s30 = scalar_lea.vmem %s1594_s12, 512  ;;  %p1493_p12 = scmp.lt.s32.totalorder %s1594_s12, %s1594_s12 }
  0x1a   :  { %p1489_p11 = scmp.ne.s32.totalorder %s1594_s12, %s1488_s30  ;;  %p1494_p13 = scmp.lt.s32.totalorder %s1488_s30, %s1488_s30 }
  0x1c   :  { %p1495_p0 = por %p1494_p13, %p1493_p12 }
  0x1e   :  { %p1496_p1 = pnand %p1495_p0, %p1489_p11 }
  0x20   :  { %1499 = shalt.err (!%p1496_p1)
}
  0x21   :  { %s1570_s0 = smov 128   ;;  %s1571_s3 = smov 8  }
  0x22   :  { %31 = dma.hbm_to_vmem [thread:$0]  %s1888_s1, 512, %s1594_s12, [#allocation6], %s1570_s0, %s1570_s0, %s1571_s3  }
  0x23   :  { %1542 = dma.done.wait [#allocation3], 32  }
  0x24   :  { %1543 = vsyncadd [#allocation3], 4294967264 }
  0x25   :  { %1544 = dma.done.wait [#allocation6], 512  }
  0x26   :  { %1545 = vsyncadd [#allocation6], 4294966784  ;;  %v1572_v0 = vmov 0.0|0.0   ;;  %vm1573_vm0 = vmmov 0   ;;  %v1574_v1 = vmov 0.0   ;;  %vm47_vm1 = vcmask 261120  }
  0x27   :  { %1369 = vmatprep.subr.bf16.mxu0 %v1572_v0  ;;  %1216 = vmatprep.mubr.msk.f32.mxu0 %vm1573_vm0, %v1574_v1  ;;  %v40_v2 = vld [vmem:[#allocation5] sm:$0xff]  ;;  %v41_v3 = vld [vmem:[#allocation5 + $0x8] sm:$0xff]  ;;  %vm1627_vm2 = vmpackc.low %vm47_vm1, %vm47_vm1  ;;  %vm136_vm3 = vcmask 254976  }
  0x28   :  { %v1631_v5 = vpack.c.bf16 %v41_v3, %v40_v2  ;;  %v1633_v6 = vld [vmem:[#allocation2] sm:$0x3]  ;;  %v42_v7 = vld [vmem:[#allocation5 + $0x10] sm:$0xff] }
  0x29   :  { %v43_v8 = vld [vmem:[#allocation5 + $0x18] sm:$0xff]  ;;  %1448 = vtanh.f32 %v1633_v6 }
  0x2a   :  { %1372 = vmatpush3.bf16.xpose.msk.msra.mxu0 %vm1627_vm2, %v1631_v5  ;;  %v1639_v9 = vpack.c.bf16 %v43_v8, %v42_v7 }
  0x2b   :  { %1373 = vmatprep.subr.bf16.mxu0 %v1572_v0 }
  0x32   :  { %1376 = vmatpush3.bf16.xpose.msk.msra.mxu0 %vm1627_vm2, %v1639_v9 }
  0x33   :  { %v1449_v10 = vpop.eup %1448  }
  0x34   :  { %v1893_v26 = vmov %v1449_v10 }
  0x39   :  { %1217 = vmatmul.mubr.msk.f32.vlgmr.msra.gmra.mrb[0].mxu0 %vm47_vm1, %v1449_v10 }
 0x10c   :  { %v129_v11 = vpop.f32.mrb[0].mxu0 }
 0x10d   :  { %v130_v12 = vadd.f32 %v129_v11, %v1633_v6  ;;  %v1218_v13 = vpop.f32.mrb[1].mxu0 }
 0x10f   :  { %1450 = vtanh.f32 %v130_v12 }
 0x119   :  { %v1451_v14 = vpop.eup %1450  }
 0x11a   :  { %v134_v15 = vsub.f32 %v1449_v10, %v1451_v14  ;;  %v1892_v25 = vmov %v1451_v14 }
 0x11c   :  { %v135_v16 = vmul.f32 %v134_v15, %v134_v15 }
 0x11e   :  { %v137_v17 = vsel %vm136_vm3, %v135_v16, 0.0 }
 0x11f   :  { %138 = vadd.xlane.f32.xlu0 %v137_v17 }
 0x1ac   :  { %v139_v18 = vpop.xlane.xlu0 %138 }
 0x1ad   :  { %v140_v19 = vrot.slane %v139_v18, 4 }
 0x1af   :  { %v141_v20 = vadd.f32 %v140_v19, %v139_v18 }
 0x1b1   :  { %v142_v21 = vrot.slane %v141_v20, 2 }
 0x1b3   :  { %v143_v22 = vadd.f32 %v142_v21, %v141_v20 }
 0x1b5   :  { %v144_v23 = vrot.slane %v143_v22, 1 }
 0x1b7   :  { %v145_v24 = vadd.f32 %v144_v23, %v143_v22 }
 0x1b9   :  { %1393 = vpush %v145_v24 }
 0x1ea   :  { %s1394_s1 = spop %1393 }
 0x1eb   :  { %p147_p2 = scmp.ge.f32.partialorder %s1394_s1, 9.999999e-09 }
 0x1ec   :  { %s1655_s6 = smov (%p147_p2), 0  }
 0x1ed   :  { %1106 = sbr.rel (!%p147_p2) target bundleno = 4679 (0x1247), region = 37 }
 0x1f4 LB: > { %v1666_v27 = vsel %vm47_vm1, %v1631_v5, 0  ;;  %v1575_v28 = vmov 0.0   ;;  %vm1576_vm4 = vmmov 0   ;;  %v1680_v29 = vsel %vm47_vm1, %v1639_v9, 0  ;;  %s1072_s6 = sadd.s32 2, %s1558_s6   ;;  %s1558_s6 = sphi %s1655_s6, %s1072_s6   ;;  %v1554_v10 = vphi %v1449_v10, %v1895_v10   ;;  %v1550_v14 = vphi %v1451_v14, %v1894_v14  }
 0x1f5   : > { %1219 = vmatprep.subr.bf16.mxu0 %v1575_v28  ;;  %1223 = vmatprep.mubr.msk.bf16.mxu0 %vm1576_vm4, %v1575_v28  ;;  %v1683_v30 = vsub.f32 %v1554_v10, %v1550_v14  ;;  %v161_v32 = vmul.f32 %v1550_v14, %v1550_v14  ;;  %v1577_v17 = vmov 0.0|0.0   ;;  %p154_p4 = scmp.lt.s32.totalorder %s1072_s6, 50 }
 0x1f6   : > { %1220 = vmatpush3.bf16.xpose.msra.mxu0 %v1666_v27  ;;  %1227 = vmatprep.subr.bf16.mxu1 %v1575_v28 }
 0x1f7   : > { %1221 = vmatprep.subr.bf16.mxu0 %v1575_v28  ;;  %1228 = vmatpush3.bf16.xpose.msra.mxu1 %v1666_v27  ;;  %v163_v31 = vpack.c.bf16 %v1683_v30, %v1683_v30  ;;  %v1698_v33 = vsub.f32 1.0, %v161_v32 }
 0x1f8   : > { %1229 = vmatprep.subr.bf16.mxu1 %v1575_v28  ;;  %1231 = vmatprep.mubr.msk.bf16.mxu1 %vm1576_vm4, %v1575_v28 }
 0x1fe   : > { %1222 = vmatpush3.bf16.xpose.msra.mxu0 %v1680_v29 }
 0x1ff   : > { %1230 = vmatpush3.bf16.xpose.msra.mxu1 %v1680_v29  ;;  %1235 = vmatprep.subr.bf16.mxu0 %v1575_v28 }
 0x200   : > { %1243 = vmatprep.subr.bf16.mxu1 %v1575_v28 }
 0x205   : > { %1224 = vmatmul.mubr.msk.bf16.vlgmr.msra.gmra.mrb[0].mxu0 %vm47_vm1, %v163_v31 }
 0x206   : > { %1236 = vmatpush3.bf16.xpose.msra.mxu0 %v1666_v27  ;;  %1239 = vmatprep.mubr.msk.bf16.mxu0 %vm1576_vm4, %v1575_v28 }
 0x207   : > { %1237 = vmatprep.subr.bf16.mxu0 %v1575_v28 }
 0x20e   : > { %1238 = vmatpush3.bf16.xpose.msra.mxu0 %v1680_v29 }
 0x20f   : > { %1251 = vmatprep.subr.bf16.mxu0 %v1575_v28 }
 0x2d8   : > { %v207_v34 = vpop.f32.mrb[0].mxu0 }
 0x2d9   : > { %v213_v35 = vmul.f32 %v207_v34, %v1698_v33  ;;  %v1225_v36 = vpop.f32.mrb[1].mxu0 }
 0x2da   : > { %v210_v37 = vpop.f32.mrb[2].mxu0 }
 0x2db   : > { %v214_v38 = vadd.f32 %v213_v35, %v1683_v30  ;;  %v1226_v39 = vpop.f32.mrb[3].mxu0 }
 0x2dd   : > { %v215_v40 = vpack.c.bf16 %v214_v38, %v214_v38 }
 0x2df   : > { %1232 = vmatmul.mubr.msk.bf16.vlgmr.msra.gmra.mrb[0].mxu1 %vm47_vm1, %v215_v40 }
 0x2e0   : > { %1244 = vmatpush3.bf16.xpose.msra.mxu1 %v1666_v27  ;;  %1247 = vmatprep.mubr.msk.bf16.mxu1 %vm1576_vm4, %v1575_v28 }
 0x2e1   : > { %1245 = vmatprep.subr.bf16.mxu1 %v1575_v28 }
 0x2e8   : > { %1246 = vmatpush3.bf16.xpose.msra.mxu1 %v1680_v29 }
 0x2e9   : > { %1259 = vmatprep.subr.bf16.mxu1 %v1575_v28 }
 0x3b2   : > { %v253_v41 = vpop.f32.mrb[0].mxu1 }
 0x3b3   : > { %v259_v42 = vmul.f32 %v253_v41, %v1698_v33  ;;  %v1233_v43 = vpop.f32.mrb[1].mxu1 }
 0x3b4   : > { %v256_v44 = vpop.f32.mrb[2].mxu1 }
 0x3b5   : > { %v260_v45 = vadd.f32 %v259_v42, %v1683_v30  ;;  %v1234_v46 = vpop.f32.mrb[3].mxu1 }
 0x3b7   : > { %v261_v47 = vpack.c.bf16 %v260_v45, %v260_v45 }
 0x3b9   : > { %1240 = vmatmul.mubr.msk.bf16.vlgmr.msra.gmra.mrb[4].mxu0 %vm47_vm1, %v261_v47 }
 0x3ba   : > { %1252 = vmatpush3.bf16.xpose.msra.mxu0 %v1666_v27  ;;  %1255 = vmatprep.mubr.msk.bf16.mxu0 %vm1576_vm4, %v1575_v28 }
 0x3bb   : > { %1253 = vmatprep.subr.bf16.mxu0 %v1575_v28 }
 0x3c2   : > { %1254 = vmatpush3.bf16.xpose.msra.mxu0 %v1680_v29 }
 0x3c3   : > { %1267 = vmatprep.subr.bf16.mxu0 %v1575_v28 }
 0x48c   : > { %v299_v48 = vpop.f32.mrb[4].mxu0 }
 0x48d   : > { %v305_v49 = vmul.f32 %v299_v48, %v1698_v33  ;;  %v1241_v50 = vpop.f32.mrb[5].mxu0 }
 0x48e   : > { %v302_v51 = vpop.f32.mrb[6].mxu0 }
 0x48f   : > { %v306_v52 = vadd.f32 %v305_v49, %v1683_v30  ;;  %v1242_v53 = vpop.f32.mrb[7].mxu0 }
 0x491   : > { %v307_v54 = vpack.c.bf16 %v306_v52, %v306_v52 }
 0x493   : > { %1248 = vmatmul.mubr.msk.bf16.vlgmr.msra.gmra.mrb[4].mxu1 %vm47_vm1, %v307_v54 }
 0x494   : > { %1260 = vmatpush3.bf16.xpose.msra.mxu1 %v1666_v27  ;;  %1263 = vmatprep.mubr.msk.bf16.mxu1 %vm1576_vm4, %v1575_v28 }
 0x495   : > { %1261 = vmatprep.subr.bf16.mxu1 %v1575_v28 }
 0x49c   : > { %1262 = vmatpush3.bf16.xpose.msra.mxu1 %v1680_v29 }
 0x49d   : > { %1275 = vmatprep.subr.bf16.mxu1 %v1575_v28 }
 0x566   : > { %v345_v55 = vpop.f32.mrb[4].mxu1 }
 0x567   : > { %v351_v56 = vmul.f32 %v345_v55, %v1698_v33  ;;  %v1249_v57 = vpop.f32.mrb[5].mxu1 }
 0x568   : > { %v348_v58 = vpop.f32.mrb[6].mxu1 }
 0x569   : > { %v352_v59 = vadd.f32 %v351_v56, %v1683_v30  ;;  %v1250_v60 = vpop.f32.mrb[7].mxu1 }
 0x56b   : > { %v353_v61 = vpack.c.bf16 %v352_v59, %v352_v59 }
 0x56d   : > { %1256 = vmatmul.mubr.msk.bf16.vlgmr.msra.gmra.mrb[8].mxu0 %vm47_vm1, %v353_v61 }
 0x56e   : > { %1268 = vmatpush3.bf16.xpose.msra.mxu0 %v1666_v27  ;;  %1271 = vmatprep.mubr.msk.bf16.mxu0 %vm1576_vm4, %v1575_v28 }
 0x56f   : > { %1269 = vmatprep.subr.bf16.mxu0 %v1575_v28 }
 0x576   : > { %1270 = vmatpush3.bf16.xpose.msra.mxu0 %v1680_v29 }
 0x577   : > { %1377 = vmatprep.subr.bf16.mxu0 %v1577_v17 }
 0x640   : > { %v391_v62 = vpop.f32.mrb[8].mxu0 }
 0x641   : > { %v397_v63 = vmul.f32 %v391_v62, %v1698_v33  ;;  %v1257_v0 = vpop.f32.mrb[9].mxu0 }
 0x642   : > { %v394_v1 = vpop.f32.mrb[10].mxu0 }
 0x643   : > { %v398_v2 = vadd.f32 %v397_v63, %v1683_v30  ;;  %v1258_v3 = vpop.f32.mrb[11].mxu0 }
 0x645   : > { %v399_v7 = vpack.c.bf16 %v398_v2, %v398_v2 }
 0x647   : > { %1264 = vmatmul.mubr.msk.bf16.vlgmr.msra.gmra.mrb[8].mxu1 %vm47_vm1, %v399_v7 }
 0x648   : > { %1276 = vmatpush3.bf16.xpose.msra.mxu1 %v1666_v27  ;;  %1279 = vmatprep.mubr.msk.bf16.mxu1 %vm1576_vm4, %v1575_v28 }
 0x649   : > { %1277 = vmatprep.subr.bf16.mxu1 %v1575_v28 }
 0x650   : > { %1278 = vmatpush3.bf16.xpose.msra.mxu1 %v1680_v29 }
 0x651   : > { %1294 = vmatprep.subr.bf16.mxu1 %v1575_v28 }
 0x71a   : > { %v437_v8 = vpop.f32.mrb[8].mxu1 }
 0x71b   : > { %v443_v11 = vmul.f32 %v437_v8, %v1698_v33  ;;  %v1265_v12 = vpop.f32.mrb[9].mxu1 }
 0x71c   : > { %v440_v13 = vpop.f32.mrb[10].mxu1 }
 0x71d   : > { %v444_v14 = vadd.f32 %v443_v11, %v1683_v30  ;;  %v1266_v15 = vpop.f32.mrb[11].mxu1 }
 0x71f   : > { %v445_v16 = vpack.c.bf16 %v444_v14, %v444_v14 }
 0x721   : > { %1272 = vmatmul.mubr.msk.bf16.vlgmr.msra.gmra.mrb[12].mxu0 %vm47_vm1, %v445_v16 }
 0x722   : > { %1291 = vmatprep.mubr.msk.f32.mxu0 %vm1576_vm4, %v1575_v28  ;;  %1380 = vmatpush3.bf16.xpose.msk.msra.mxu0 %vm1627_vm2, %v1631_v5 }
 0x723   : > { %1381 = vmatprep.subr.bf16.mxu0 %v1577_v17 }
 0x72a   : > { %1384 = vmatpush3.bf16.xpose.msk.msra.mxu0 %vm1627_vm2, %v1639_v9 }
 0x72b   : > { %1302 = vmatprep.subr.bf16.mxu0 %v1575_v28 }
 0x7f4   : > { %v483_v18 = vpop.f32.mrb[12].mxu0 }
 0x7f5   : > { %v489_v19 = vmul.f32 %v483_v18, %v1698_v33  ;;  %v1273_v20 = vpop.f32.mrb[13].mxu0 }
 0x7f6   : > { %v486_v21 = vpop.f32.mrb[14].mxu0 }
 0x7f7   : > { %v490_v22 = vadd.f32 %v489_v19, %v1683_v30  ;;  %v1274_v23 = vpop.f32.mrb[15].mxu0 }
 0x7f9   : > { %v491_v24 = vpack.c.bf16 %v490_v22, %v490_v22 }
 0x7fb   : > { %1280 = vmatmul.mubr.msk.bf16.vlgmr.msra.gmra.mrb[12].mxu1 %vm47_vm1, %v491_v24 }
 0x7fc   : > { %1295 = vmatpush3.bf16.xpose.msra.mxu1 %v1666_v27  ;;  %1298 = vmatprep.mubr.msk.bf16.mxu1 %vm1576_vm4, %v1575_v28 }
 0x7fd   : > { %1296 = vmatprep.subr.bf16.mxu1 %v1575_v28 }
 0x804   : > { %1297 = vmatpush3.bf16.xpose.msra.mxu1 %v1680_v29 }
 0x805   : > { %1310 = vmatprep.subr.bf16.mxu1 %v1575_v28 }
 0x8ce   : > { %v529_v25 = vpop.f32.mrb[12].mxu1 }
 0x8cf   : > { %v535_v26 = vmul.f32 %v529_v25, %v1698_v33  ;;  %v1281_v31 = vpop.f32.mrb[13].mxu1 }
 0x8d0   : > { %v532_v32 = vpop.f32.mrb[14].mxu1 }
 0x8d1   : > { %v536_v34 = vadd.f32 %v535_v26, %v1683_v30  ;;  %v1282_v35 = vpop.f32.mrb[15].mxu1 }
 0x8d3   : > { %v1770_v36 = vsub.f32 %v1554_v10, %v536_v34 }
 0x8d5   : > { %1292 = vmatmul.mubr.msk.f32.vlgmr.msra.gmra.mrb[16].mxu0 %vm47_vm1, %v1770_v36 }
 0x8d6   : > { %1303 = vmatpush3.bf16.xpose.msra.mxu0 %v1666_v27  ;;  %1306 = vmatprep.mubr.msk.bf16.mxu0 %vm1576_vm4, %v1575_v28 }
 0x8d7   : > { %1304 = vmatprep.subr.bf16.mxu0 %v1575_v28 }
 0x8de   : > { %1305 = vmatpush3.bf16.xpose.msra.mxu0 %v1680_v29 }
 0x8df   : > { %1318 = vmatprep.subr.bf16.mxu0 %v1575_v28 }
 0x9a8   : > { %v607_v33 = vpop.f32.mrb[16].mxu0 }
 0x9a9   : > { %v608_v30 = vadd.f32 %v607_v33, %v1633_v6  ;;  %v1293_v37 = vpop.f32.mrb[17].mxu0 }
 0x9ab   : > { %1452 = vtanh.f32 %v608_v30 }
 0x9b5   : > { %v1453_v10 = vpop.eup %1452 }
 0x9b6   : > { %v1782_v38 = vsub.f32 %v1770_v36, %v1453_v10  ;;  %v613_v40 = vmul.f32 %v1453_v10, %v1453_v10 }
 0x9b8   : > { %v615_v39 = vpack.c.bf16 %v1782_v38, %v1782_v38  ;;  %v1793_v41 = vsub.f32 1.0, %v613_v40 }
 0x9ba   : > { %1299 = vmatmul.mubr.msk.bf16.vlgmr.msra.gmra.mrb[16].mxu1 %vm47_vm1, %v615_v39 }
 0x9bb   : > { %1311 = vmatpush3.bf16.xpose.msra.mxu1 %v1666_v27  ;;  %1314 = vmatprep.mubr.msk.bf16.mxu1 %vm1576_vm4, %v1575_v28 }
 0x9bc   : > { %1312 = vmatprep.subr.bf16.mxu1 %v1575_v28 }
 0x9c3   : > { %1313 = vmatpush3.bf16.xpose.msra.mxu1 %v1680_v29 }
 0x9c4   : > { %1326 = vmatprep.subr.bf16.mxu1 %v1575_v28 }
 0xa8d   : > { %v653_v42 = vpop.f32.mrb[16].mxu1 }
 0xa8e   : > { %v659_v43 = vmul.f32 %v653_v42, %v1793_v41  ;;  %v1300_v44 = vpop.f32.mrb[17].mxu1 }
 0xa8f   : > { %v656_v45 = vpop.f32.mrb[18].mxu1 }
 0xa90   : > { %v660_v46 = vadd.f32 %v659_v43, %v1782_v38  ;;  %v1301_v47 = vpop.f32.mrb[19].mxu1 }
 0xa92   : > { %v661_v48 = vpack.c.bf16 %v660_v46, %v660_v46 }
 0xa94   : > { %1307 = vmatmul.mubr.msk.bf16.vlgmr.msra.gmra.mrb[20].mxu0 %vm47_vm1, %v661_v48 }
 0xa95   : > { %1319 = vmatpush3.bf16.xpose.msra.mxu0 %v1666_v27  ;;  %1322 = vmatprep.mubr.msk.bf16.mxu0 %vm1576_vm4, %v1575_v28 }
 0xa96   : > { %1320 = vmatprep.subr.bf16.mxu0 %v1575_v28 }
 0xa9d   : > { %1321 = vmatpush3.bf16.xpose.msra.mxu0 %v1680_v29 }
 0xa9e   : > { %1334 = vmatprep.subr.bf16.mxu0 %v1575_v28 }
 0xb67   : > { %v699_v49 = vpop.f32.mrb[20].mxu0 }
 0xb68   : > { %v705_v50 = vmul.f32 %v699_v49, %v1793_v41  ;;  %v1308_v51 = vpop.f32.mrb[21].mxu0 }
 0xb69   : > { %v702_v52 = vpop.f32.mrb[22].mxu0 }
 0xb6a   : > { %v706_v53 = vadd.f32 %v705_v50, %v1782_v38  ;;  %v1309_v54 = vpop.f32.mrb[23].mxu0 }
 0xb6c   : > { %v707_v55 = vpack.c.bf16 %v706_v53, %v706_v53 }
 0xb6e   : > { %1315 = vmatmul.mubr.msk.bf16.vlgmr.msra.gmra.mrb[20].mxu1 %vm47_vm1, %v707_v55 }
 0xb6f   : > { %1327 = vmatpush3.bf16.xpose.msra.mxu1 %v1666_v27  ;;  %1330 = vmatprep.mubr.msk.bf16.mxu1 %vm1576_vm4, %v1575_v28 }
 0xb70   : > { %1328 = vmatprep.subr.bf16.mxu1 %v1575_v28 }
 0xb77   : > { %1329 = vmatpush3.bf16.xpose.msra.mxu1 %v1680_v29 }
 0xb78   : > { %1342 = vmatprep.subr.bf16.mxu1 %v1575_v28 }
 0xc41   : > { %v745_v56 = vpop.f32.mrb[20].mxu1 }
 0xc42   : > { %v751_v57 = vmul.f32 %v745_v56, %v1793_v41  ;;  %v1316_v58 = vpop.f32.mrb[21].mxu1 }
 0xc43   : > { %v748_v59 = vpop.f32.mrb[22].mxu1 }
 0xc44   : > { %v752_v60 = vadd.f32 %v751_v57, %v1782_v38  ;;  %v1317_v61 = vpop.f32.mrb[23].mxu1 }
 0xc46   : > { %v753_v62 = vpack.c.bf16 %v752_v60, %v752_v60 }
 0xc48   : > { %1323 = vmatmul.mubr.msk.bf16.vlgmr.msra.gmra.mrb[24].mxu0 %vm47_vm1, %v753_v62 }
 0xc49   : > { %1335 = vmatpush3.bf16.xpose.msra.mxu0 %v1666_v27  ;;  %1338 = vmatprep.mubr.msk.bf16.mxu0 %vm1576_vm4, %v1575_v28 }
 0xc4a   : > { %1336 = vmatprep.subr.bf16.mxu0 %v1575_v28 }
 0xc51   : > { %1337 = vmatpush3.bf16.xpose.msra.mxu0 %v1680_v29 }
 0xc52   : > { %1350 = vmatprep.subr.bf16.mxu0 %v1575_v28 }
 0xd1b   : > { %v791_v63 = vpop.f32.mrb[24].mxu0 }
 0xd1c   : > { %v797_v0 = vmul.f32 %v791_v63, %v1793_v41  ;;  %v1324_v1 = vpop.f32.mrb[25].mxu0 }
 0xd1d   : > { %v794_v2 = vpop.f32.mrb[26].mxu0 }
 0xd1e   : > { %v798_v3 = vadd.f32 %v797_v0, %v1782_v38  ;;  %v1325_v7 = vpop.f32.mrb[27].mxu0 }
 0xd20   : > { %v799_v8 = vpack.c.bf16 %v798_v3, %v798_v3 }
 0xd22   : > { %1331 = vmatmul.mubr.msk.bf16.vlgmr.msra.gmra.mrb[24].mxu1 %vm47_vm1, %v799_v8 }
 0xd23   : > { %1343 = vmatpush3.bf16.xpose.msra.mxu1 %v1666_v27  ;;  %1346 = vmatprep.mubr.msk.bf16.mxu1 %vm1576_vm4, %v1575_v28 }
 0xd24   : > { %1344 = vmatprep.subr.bf16.mxu1 %v1575_v28 }
 0xd2b   : > { %1345 = vmatpush3.bf16.xpose.msra.mxu1 %v1680_v29 }
 0xd2c   : > { %1385 = vmatprep.subr.bf16.mxu1 %v1577_v17 }
 0xdf5   : > { %v837_v11 = vpop.f32.mrb[24].mxu1 }
 0xdf6   : > { %v843_v12 = vmul.f32 %v837_v11, %v1793_v41  ;;  %v1332_v13 = vpop.f32.mrb[25].mxu1 }
 0xdf7   : > { %v840_v14 = vpop.f32.mrb[26].mxu1 }
 0xdf8   : > { %v844_v15 = vadd.f32 %v843_v12, %v1782_v38  ;;  %v1333_v16 = vpop.f32.mrb[27].mxu1 }
 0xdfa   : > { %v845_v18 = vpack.c.bf16 %v844_v15, %v844_v15 }
 0xdfc   : > { %1339 = vmatmul.mubr.msk.bf16.vlgmr.msra.gmra.mrb[28].mxu0 %vm47_vm1, %v845_v18 }
 0xdfd   : > { %1351 = vmatpush3.bf16.xpose.msra.mxu0 %v1666_v27  ;;  %1354 = vmatprep.mubr.msk.bf16.mxu0 %vm1576_vm4, %v1575_v28 }
 0xdfe   : > { %1352 = vmatprep.subr.bf16.mxu0 %v1575_v28 }
 0xe05   : > { %1353 = vmatpush3.bf16.xpose.msra.mxu0 %v1680_v29 }
 0xecf   : > { %v883_v19 = vpop.f32.mrb[28].mxu0 }
 0xed0   : > { %v889_v20 = vmul.f32 %v883_v19, %v1793_v41  ;;  %v1340_v21 = vpop.f32.mrb[29].mxu0 }
 0xed1   : > { %v886_v22 = vpop.f32.mrb[30].mxu0 }
 0xed2   : > { %v890_v23 = vadd.f32 %v889_v20, %v1782_v38  ;;  %v1341_v24 = vpop.f32.mrb[31].mxu0 }
 0xed4   : > { %v891_v25 = vpack.c.bf16 %v890_v23, %v890_v23 }
 0xed6   : > { %1347 = vmatmul.mubr.msk.bf16.vlgmr.msra.gmra.mrb[28].mxu1 %vm47_vm1, %v891_v25 }
 0xed7   : > { %1388 = vmatpush3.bf16.xpose.msk.msra.mxu1 %vm1627_vm2, %v1631_v5  ;;  %1366 = vmatprep.mubr.msk.f32.mxu1 %vm1576_vm4, %v1575_v28 }
 0xed8   : > { %1389 = vmatprep.subr.bf16.mxu1 %v1577_v17 }
 0xedf   : > { %1392 = vmatpush3.bf16.xpose.msk.msra.mxu1 %vm1627_vm2, %v1639_v9 }
 0xfa9   : > { %v929_v27 = vpop.f32.mrb[28].mxu1 }
 0xfaa   : > { %v935_v29 = vmul.f32 %v929_v27, %v1793_v41  ;;  %v1348_v26 = vpop.f32.mrb[29].mxu1 }
 0xfab   : > { %v932_v31 = vpop.f32.mrb[30].mxu1 }
 0xfac   : > { %v936_v32 = vadd.f32 %v935_v29, %v1782_v38  ;;  %v1349_v34 = vpop.f32.mrb[31].mxu1 }
 0xfae   : > { %v937_v35 = vpack.c.bf16 %v936_v32, %v936_v32 }
 0xfb0   : > { %1355 = vmatmul.mubr.msk.bf16.vlgmr.msra.gmra.mrb[32].mxu0 %vm47_vm1, %v937_v35 }
0x1083   : > { %v975_v33 = vpop.f32.mrb[32].mxu0 }
0x1084   : > { %v981_v28 = vmul.f32 %v975_v33, %v1793_v41  ;;  %v1356_v17 = vpop.f32.mrb[33].mxu0 }
0x1085   : > { %v978_v30 = vpop.f32.mrb[34].mxu0 }
0x1086   : > { %v982_v37 = vadd.f32 %v981_v28, %v1782_v38  ;;  %v1357_v10 = vpop.f32.mrb[35].mxu0 }
0x1088   : > { %v983_v39 = vsub.f32 %v1770_v36, %v982_v37  }
0x108a   : > { %1367 = vmatmul.mubr.msk.f32.vlgmr.msra.gmra.mrb[32].mxu1 %vm47_vm1, %v983_v39  ;;  %v1895_v10 = vmov %v983_v39 }
0x115d   : > { %v1053_v40 = vpop.f32.mrb[32].mxu1 }
0x115e   : > { %v1054_v42 = vadd.f32 %v1053_v40, %v1633_v6  ;;  %v1368_v43 = vpop.f32.mrb[33].mxu1 }
0x1160   : > { %1454 = vtanh.f32 %v1054_v42 }
0x116a   : > { %v1455_v44 = vpop.eup %1454  }
0x116b   : > { %v1058_v45 = vsub.f32 %v983_v39, %v1455_v44  ;;  %v1894_v14 = vmov %v1455_v44 }
0x116d   : > { %v1059_v46 = vmul.f32 %v1058_v45, %v1058_v45 }
0x116f   : > { %v1060_v41 = vsel %vm136_vm3, %v1059_v46, 0.0 }
0x1170   : > { %1061 = vadd.xlane.f32.xlu0 %v1060_v41 }
0x11fd   : > { %v1062_v47 = vpop.xlane.xlu0 %1061 }
0x11fe   : > { %v1063_v48 = vrot.slane %v1062_v47, 4 }
0x1200   : > { %v1064_v38 = vadd.f32 %v1063_v48, %v1062_v47 }
0x1202   : > { %v1065_v49 = vrot.slane %v1064_v38, 2 }
0x1204   : > { %v1066_v50 = vadd.f32 %v1065_v49, %v1064_v38 }
0x1206   : > { %v1067_v36 = vrot.slane %v1066_v50, 1 }
0x1208   : > { %v1068_v51 = vadd.f32 %v1067_v36, %v1066_v50 }
0x120a   : > { %1395 = vpush %v1068_v51 }
0x123b   : > { %s1396_s7 = spop %1395 }
0x123c   : > { %p1070_p3 = scmp.ge.f32.partialorder %s1396_s7, 9.999999e-09 }
0x123e   : > { %p156_p5 = pnand %p1070_p3, %p154_p4 }
0x123f   :  { %v1896_v25 = vmov (%p156_p5), %v1455_v44  ;;  %v1897_v26 = vmov (%p156_p5), %v983_v39 }
0x1240   :  { %159 = sbr.rel (!%p156_p5) target bundleno = 500 (0x1f4), region = 43 }
0x1247 PF:  { %v1073_v52 = vsub.f32 %v1566_v26, %v1562_v25  ;;  %s1578_s8 = smov [#allocation7]   ;;  %v1566_v26 = vphi %v1893_v26, %v1897_v26   ;;  %v1562_v25 = vphi %v1892_v25, %v1896_v25  }
0x1248   :  { %s1089_s9 = sshll.u32 %s1578_s8, 4  ;;  %s1090_s9 = int_to_ptr.vmem [resolvable:$true] %s1089_s9 }
0x1249   :  { %v1074_v53 = vmul.f32 %v1073_v52, %v1073_v52  ;;  %s1500_s10 = scalar_lea.vmem %s1090_s9, 32  ;;  %p1505_p7 = scmp.lt.s32.totalorder %s1090_s9, %s1090_s9 }
0x124a   :  { %p1501_p6 = scmp.ne.s32.totalorder %s1090_s9, %s1500_s10  ;;  %p1506_p8 = scmp.lt.s32.totalorder %s1500_s10, %s1500_s10 }
0x124b   :  { %v1075_v54 = vsel %vm136_vm3, %v1074_v53, 0.0 }
0x124c   :  { %1076 = vadd.xlane.f32.xlu0 %v1075_v54  ;;  %p1507_p9 = por %p1506_p8, %p1505_p7 }
0x124e   :  { %p1508_p10 = pnand %p1507_p9, %p1501_p6 }
0x12d9   :  { %v1077_v55 = vpop.xlane.xlu0 %1076 }
0x12da   :  { %vm1078_vm5 = vcmp.le.f32.partialorder %v1077_v55, 9.999999e-09 }
0x12db   :  { %v1081_v4 = vsel %vm1078_vm5, %v1566_v26, 0.0 }
0x12dc   :  { %1082 = vst.msk [vmem:[#allocation7] sm:$0x3] %vm136_vm3, %v1081_v4 }
0x12dd   :  { %1511 = shalt.err (!%p1508_p10)
}
0x12de   :  { %s1512_s13 = scalar_lea.hbm %s1889_s2, 32 }
0x12df   :  { %p1513_p11 = scmp.ne.s32.totalorder %s1889_s2, %s1512_s13  ;;  %p1516_p12 = scmp.lt.u32.totalorder %s1512_s13, %s1889_s2 }
0x12e1   :  { %p1518_p13 = pnand %p1516_p12, %p1513_p11 }
0x12e3   :  { %1521 = shalt.err (!%p1518_p13)
}
0x12e4   :  { %1092 = dma.vmem_to_hbm [thread:$0]  %s1090_s9, 32, %s1889_s2, [#allocation4]  }
0x12e5   :  { %1546 = dma.done.wait [#allocation4], 32  }
0x12e6   :  { %1547 = vsyncadd [#allocation4], 4294967264 }
0x12e7   :  { %1096 = vsyncpa [#allocation3], 1 }
0x12e8   :  { %1097 = vsyncpa [#allocation6], 1 }
0x12e9   :  { %1098 = vsyncpa [#allocation4], 1 }

</bundles_post_ra>
